<compile_context>
chip_gen: v6e
topology: v6e:2x2x1
jax: 0.10.0
libtpu: 0.0.40
codegen_flags: <defaults>
</compile_context>

<pallas_src>
import functools

import jax
import jax.numpy as jnp
from jax import lax
from jax.experimental import pallas as pl
from jax.experimental.pallas import tpu as pltpu

_VMEM_TILE_BUDGET = 36 * 1024 * 1024   # buffer budget used to size the row tile (fits v7x)
_VMEM_LIMIT_BYTES = 48 * 1024 * 1024   # scoped-VMEM limit handed to Mosaic (OK on v5e/v6e/v7x)


def _round_up(x, m):
    return (x + m - 1) // m * m


def _cdiv(a, b):
    return -(-a // b)


def _choose_tile_rows(m, k, e, in_item, out_item, tm_max, vmem_budget):
    """Row tile: as large as the VMEM budget allows (amortize ~0.35us/step grid
    overhead), but with >= 2 grid steps so v7x's two TensorCores both get work."""
    per_row = 2 * (k * in_item + e * out_item)       # double-buffered activation + output
    resident = k * e * in_item + 3 * e * 4           # weight + bias/gamma/beta (single copy)
    tm_cap = max(8, min(tm_max, (vmem_budget - resident) // per_row))
    n_steps = _cdiv(m, tm_cap)
    if n_steps < 2 and m > 8:                        # keep both v7x TCs busy
        n_steps = 2
    tm = min(_round_up(_cdiv(m, n_steps), 8), _round_up(m, 8))
    return tm


def _patch_embed_kernel(x_ref, w_ref, b_ref, g_ref, be_ref, o_ref, *,
                        apply_norm, eps):
    # x_ref: (tm, K)   w_ref: (K, E)   b/g/be_ref: (1, E)   o_ref: (tm, E)
    y = jnp.dot(x_ref[...], w_ref[...], preferred_element_type=jnp.float32)
    y = y + b_ref[...].astype(jnp.float32)
    if apply_norm:
        # Centered two-pass statistics: the extra XLU lane reduction is free in
        # this mem-bound kernel and avoids E[y^2] - E[y]^2 cancellation. E is the
        # logical (unpadded) lane extent, so reductions are correctly masked.
        mean = jnp.mean(y, axis=-1, keepdims=True)
        d = y - mean
        var = jnp.mean(d * d, axis=-1, keepdims=True)
        y = d * lax.rsqrt(var + eps)
        y = y * g_ref[...].astype(jnp.float32) + be_ref[...].astype(jnp.float32)
    o_ref[...] = y.astype(o_ref.dtype)


def patch_embedding(x, conv_w, conv_b, gamma, beta, *, patch_size,
                    apply_norm=True, eps=1e-5, tm_max=2048,
                    use_bf16_matmul=True, out_dtype=None,
                    vmem_tile_budget=_VMEM_TILE_BUDGET):
    """x: (B, C_in, H, W) NCHW.
    conv_w: (E, C_in, P, P) (PyTorch Conv2d layout), conv_b: (E,).
    gamma/beta: (E,) LayerNorm affine (ignored when apply_norm=False).
    Returns (B, (H//P)*(W//P), E) in `out_dtype` (defaults to x.dtype)."""
    b, c_in, h, w = x.shape
    p = patch_size
    assert h % p == 0 and w % p == 0, \
        f"input image size ({h}*{w}) not divisible by patch size {p}"
    e = conv_w.shape[0]
    hp, wp = h // p, w // p
    m = b * hp * wp
    k = c_in * p * p

    in_dtype = x.dtype
    out_dtype = jnp.dtype(in_dtype) if out_dtype is None else jnp.dtype(out_dtype)
    compute_dtype = jnp.dtype(jnp.bfloat16) if use_bf16_matmul else jnp.dtype(in_dtype)

    # ---- parameter prep (cheap at K=48/E=96; hoist to init time for ViT-sized K/E) ----
    w2d = conv_w.astype(compute_dtype).reshape(e, k).T     # (K, E), K ordered (c, ph, pw)
    bias = conv_b.astype(jnp.float32).reshape(1, e)
    g2d = gamma.astype(jnp.float32).reshape(1, e)
    be2d = beta.astype(jnp.float32).reshape(1, e)

    # ---- glue: non-overlapping PxP patch extraction (conv-as-matmul) ----
    # Cast to the compute dtype *first* so the one materialized (M, K) slab
    # costs half the HBM bytes on the bf16 path.
    # TODO(synk): fold this extraction into the kernel via a 6-D BlockSpec over
    # the (b, c, hp, p, wp, p) view; skipped because the tiny-minor-dim in-kernel
    # transpose is a Mosaic-lowering risk, and the bf16 glue already halves it.
    xc = x.astype(compute_dtype)
    patches = xc.reshape(b, c_in, hp, p, wp, p)
    patches = patches.transpose(0, 2, 4, 1, 3, 5).reshape(m, k)  # K order = (c, ph, pw)

    in_item = compute_dtype.itemsize
    out_item = out_dtype.itemsize
    tm = _choose_tile_rows(m, k, e, in_item, out_item, tm_max, vmem_tile_budget)
    m_pad = _round_up(m, tm)
    if m_pad != m:
        patches = jnp.pad(patches, ((0, m_pad - m), (0, 0)))   # single fused pad

    kernel = functools.partial(_patch_embed_kernel, apply_norm=apply_norm, eps=eps)
    cost = pl.CostEstimate(
        flops=2 * m_pad * k * e + (8 * m_pad * e if apply_norm else 0),
        transcendentals=m_pad if apply_norm else 0,
        bytes_accessed=(m_pad * k + k * e) * in_item + 3 * e * 4
                       + m_pad * e * out_item,
    )

    # NOTE: weight/bias/gamma/beta have constant index maps; pipeline_mode=
    # pl.Buffered(1) would drop their second VMEM buffer (~24 KB here, only
    # meaningful for ViT-sized K*E on v7x) - left at the default for robustness.
    out2d = pl.pallas_call(
        kernel,
        out_shape=jax.ShapeDtypeStruct((m_pad, e), out_dtype),
        grid_spec=pltpu.PrefetchScalarGridSpec(
            num_scalar_prefetch=0,
            grid=(m_pad // tm,),
            in_specs=[
                pl.BlockSpec((tm, k), lambda i: (i, 0)),   # activation row tile
                pl.BlockSpec((k, e), lambda i: (0, 0)),    # resident weight
                pl.BlockSpec((1, e), lambda i: (0, 0)),    # conv bias
                pl.BlockSpec((1, e), lambda i: (0, 0)),    # LN gamma
                pl.BlockSpec((1, e), lambda i: (0, 0)),    # LN beta
            ],
            out_specs=pl.BlockSpec((tm, e), lambda i: (i, 0)),
        ),
        compiler_params=pltpu.CompilerParams(
            dimension_semantics=("parallel",),
            vmem_limit_bytes=_VMEM_LIMIT_BYTES,
        ),
        cost_estimate=cost,
    )(patches, w2d, bias, g2d, be2d)

    if m_pad != m:
        out2d = out2d[:m]
    return out2d.reshape(b, hp * wp, e)


def reference(x, conv_w, conv_b, gamma, beta, *, patch_size, apply_norm, eps=1e-5):
    """Pure-JAX reference matching the PyTorch module semantics."""
    p = patch_size
    y = lax.conv_general_dilated(
        x, conv_w, window_strides=(p, p), padding="VALID",
        dimension_numbers=("NCHW", "OIHW", "NCHW"))
    y = y + conv_b[None, :, None, None]
    b, e, hp, wp = y.shape
    y = y.reshape(b, e, hp * wp).transpose(0, 2, 1)          # flatten(2).transpose(1, 2)
    if apply_norm:
        mean = jnp.mean(y, axis=-1, keepdims=True)
        var = jnp.mean((y - mean) ** 2, axis=-1, keepdims=True)
        y = (y - mean) / jnp.sqrt(var + eps) * gamma + beta
    return y


if __name__ == "__main__":
    # Module config (kept small): image_size=16, patch_size=4, in_channels=3,
    # embed_dim=96, batch=2.
    image_size, patch_size, in_channels, embed_dim, B = 16, 4, 3, 96, 2

    key = jax.random.PRNGKey(0)
    k_x, k_w, k_b, k_g, k_be = jax.random.split(key, 5)

    x = jax.random.normal(k_x, (B, in_channels, image_size, image_size),
                          dtype=jnp.float32)
    fan_in = in_channels * patch_size * patch_size
    conv_w = jax.random.normal(
        k_w, (embed_dim, in_channels, patch_size, patch_size),
        dtype=jnp.float32) * (1.0 / jnp.sqrt(float(fan_in)))
    conv_b = 0.02 * jax.random.normal(k_b, (embed_dim,), dtype=jnp.float32)
    gamma = 1.0 + 0.1 * jax.random.normal(k_g, (embed_dim,), dtype=jnp.float32)
    beta = 0.1 * jax.random.normal(k_be, (embed_dim,), dtype=jnp.float32)

    n_patches = (image_size // patch_size) ** 2

    ref_ln = reference(x, conv_w, conv_b, gamma, beta,
                       patch_size=patch_size, apply_norm=True)
    ref_nn = reference(x, conv_w, conv_b, gamma, beta,
                       patch_size=patch_size, apply_norm=False)

    # 1) Recommended fast path: bf16 matmul inputs + bf16 output, LayerNorm on.
    out_fast = jax.block_until_ready(patch_embedding(
        x, conv_w, conv_b, gamma, beta, patch_size=patch_size,
        apply_norm=True, out_dtype=jnp.bfloat16))
    assert out_fast.shape == (B, n_patches, embed_dim)
    assert out_fast.dtype == jnp.bfloat16
    assert jnp.allclose(out_fast.astype(jnp.float32), ref_ln, atol=5e-2, rtol=5e-2), \
        "bf16 LN path mismatch vs reference"

    # 2) Precise f32 path, LayerNorm on (tight tolerance).
    out_f32 = jax.block_until_ready(patch_embedding(
        x, conv_w, conv_b, gamma, beta, patch_size=patch_size,
        apply_norm=True, use_bf16_matmul=False))
    assert jnp.allclose(out_f32, ref_ln, atol=1e-4, rtol=1e-4), \
        "f32 LN path mismatch vs reference"

    # 3) norm=None (module default), precise f32 path.
    out_nn = jax.block_until_ready(patch_embedding(
        x, conv_w, conv_b, gamma, beta, patch_size=patch_size,
        apply_norm=False, use_bf16_matmul=False))
    assert jnp.allclose(out_nn, ref_nn, atol=1e-4, rtol=1e-4), \
        "f32 no-norm path mismatch vs reference"

    # 4) norm=None, fast bf16 path.
    out_nn_fast = jax.block_until_ready(patch_embedding(
        x, conv_w, conv_b, gamma, beta, patch_size=patch_size,
        apply_norm=False, out_dtype=jnp.bfloat16))
    assert jnp.allclose(out_nn_fast.astype(jnp.float32), ref_nn, atol=5e-2, rtol=5e-2), \
        "bf16 no-norm path mismatch vs reference"

    print("KERNEL_OK")
</pallas_src>

<mosaic_0001>
module attributes {stable_mosaic.version = 11 : i64} {
  func.func @_patch_embed_kernel(%arg0: i32, %arg1: memref<16x48xbf16, #tpu.memory_space<vmem>>, %arg2: memref<48x96xbf16, #tpu.memory_space<vmem>>, %arg3: memref<1x96xf32, #tpu.memory_space<vmem>>, %arg4: memref<1x96xf32, #tpu.memory_space<vmem>>, %arg5: memref<1x96xf32, #tpu.memory_space<vmem>>, %arg6: memref<16x96xbf16, #tpu.memory_space<vmem>>) attributes {dimension_semantics = [#tpu.dimension_semantics<parallel>], iteration_bounds = array<i64: 2>, scalar_prefetch = 0 : i64, scratch_operands = 0 : i64, tpu.core_type = #tpu.core_type<tc>, window_params = [{transform_indices = @transform_0, window_bounds = array<i64: 16, 48>}, {pipeline_mode = #tpu.pipeline_mode<synchronous>, transform_indices = @transform_1, window_bounds = array<i64: 48, 96>}, {pipeline_mode = #tpu.pipeline_mode<synchronous>, transform_indices = @transform_2, window_bounds = array<i64: 1, 96>}, {pipeline_mode = #tpu.pipeline_mode<synchronous>, transform_indices = @transform_3, window_bounds = array<i64: 1, 96>}, {pipeline_mode = #tpu.pipeline_mode<synchronous>, transform_indices = @transform_4, window_bounds = array<i64: 1, 96>}, {transform_indices = @transform_5, window_bounds = array<i64: 16, 96>}]} {
    %c0 = arith.constant 0 : index
    %c0_0 = arith.constant 0 : index
    %0 = vector.load %arg1[%c0, %c0_0] : memref<16x48xbf16, #tpu.memory_space<vmem>>, vector<16x48xbf16>
    %c0_1 = arith.constant 0 : index
    %c0_2 = arith.constant 0 : index
    %1 = vector.load %arg2[%c0_1, %c0_2] : memref<48x96xbf16, #tpu.memory_space<vmem>>, vector<48x96xbf16>
    %cst = arith.constant dense<0.000000e+00> : vector<16x96xf32>
    %2 = tpu.matmul %0, %1, %cst {dimension_numbers = #tpu.dot_dimension_numbers<[1], [0], [0], [1], [0, 0, 1, 1], [], []>} : vector<16x48xbf16>, vector<48x96xbf16>, vector<16x96xf32> -> vector<16x96xf32>
    %c0_3 = arith.constant 0 : index
    %c0_4 = arith.constant 0 : index
    %3 = vector.load %arg3[%c0_3, %c0_4] : memref<1x96xf32, #tpu.memory_space<vmem>>, vector<1x96xf32>
    %4 = vector.broadcast %3 : vector<1x96xf32> to vector<16x96xf32>
    %5 = arith.addf %2, %4 : vector<16x96xf32>
    %cst_5 = arith.constant dense<0.000000e+00> : vector<16xf32>
    %6 = vector.multi_reduction <add>, %5, %cst_5 [1] : vector<16x96xf32> to vector<16xf32>
    %7 = vector.shape_cast %6 : vector<16xf32> to vector<16x1xf32>
    %cst_6 = arith.constant 9.600000e+01 : f32
    %8 = vector.broadcast %cst_6 : f32 to vector<16x1xf32>
    %9 = arith.divf %7, %8 : vector<16x1xf32>
    %10 = vector.broadcast %9 : vector<16x1xf32> to vector<16x96xf32>
    %11 = arith.subf %5, %10 : vector<16x96xf32>
    %12 = arith.mulf %11, %11 : vector<16x96xf32>
    %cst_7 = arith.constant dense<0.000000e+00> : vector<16xf32>
    %13 = vector.multi_reduction <add>, %12, %cst_7 [1] : vector<16x96xf32> to vector<16xf32>
    %14 = vector.shape_cast %13 : vector<16xf32> to vector<16x1xf32>
    %cst_8 = arith.constant 9.600000e+01 : f32
    %15 = vector.broadcast %cst_8 : f32 to vector<16x1xf32>
    %16 = arith.divf %14, %15 : vector<16x1xf32>
    %cst_9 = arith.constant 9.99999974E-6 : f32
    %17 = vector.broadcast %cst_9 : f32 to vector<16x1xf32>
    %18 = arith.addf %16, %17 : vector<16x1xf32>
    %19 = math.rsqrt %18 : vector<16x1xf32>
    %20 = vector.broadcast %19 : vector<16x1xf32> to vector<16x96xf32>
    %21 = arith.mulf %11, %20 : vector<16x96xf32>
    %c0_10 = arith.constant 0 : index
    %c0_11 = arith.constant 0 : index
    %22 = vector.load %arg4[%c0_10, %c0_11] : memref<1x96xf32, #tpu.memory_space<vmem>>, vector<1x96xf32>
    %23 = vector.broadcast %22 : vector<1x96xf32> to vector<16x96xf32>
    %24 = arith.mulf %21, %23 : vector<16x96xf32>
    %c0_12 = arith.constant 0 : index
    %c0_13 = arith.constant 0 : index
    %25 = vector.load %arg5[%c0_12, %c0_13] : memref<1x96xf32, #tpu.memory_space<vmem>>, vector<1x96xf32>
    %26 = vector.broadcast %25 : vector<1x96xf32> to vector<16x96xf32>
    %27 = arith.addf %24, %26 : vector<16x96xf32>
    %28 = arith.truncf %27 : vector<16x96xf32> to vector<16x96xbf16>
    %c0_14 = arith.constant 0 : index
    %c0_15 = arith.constant 0 : index
    %29 = vector.load %arg6[%c0_14, %c0_15] : memref<16x96xbf16, #tpu.memory_space<vmem>>, vector<16x96xbf16>
    tpu.vector_store %arg6[%c0_14, %c0_15], %28 {strides = array<i32>} : memref<16x96xbf16, #tpu.memory_space<vmem>>, vector<16x96xbf16>,
    return
  }
  func.func @transform_0(%arg0: i32) -> (i32, i32) {
    %c0_i32 = arith.constant 0 : i32
    %c0_i32_0 = arith.constant 0 : i32
    return %arg0, %c0_i32 : i32, i32
  }
  func.func @transform_1(%arg0: i32) -> (i32, i32) {
    %c0_i32 = arith.constant 0 : i32
    %c0_i32_0 = arith.constant 0 : i32
    %c0_i32_1 = arith.constant 0 : i32
    return %c0_i32, %c0_i32_0 : i32, i32
  }
  func.func @transform_2(%arg0: i32) -> (i32, i32) {
    %c0_i32 = arith.constant 0 : i32
    %c0_i32_0 = arith.constant 0 : i32
    %c0_i32_1 = arith.constant 0 : i32
    return %c0_i32, %c0_i32_0 : i32, i32
  }
  func.func @transform_3(%arg0: i32) -> (i32, i32) {
    %c0_i32 = arith.constant 0 : i32
    %c0_i32_0 = arith.constant 0 : i32
    %c0_i32_1 = arith.constant 0 : i32
    return %c0_i32, %c0_i32_0 : i32, i32
  }
  func.func @transform_4(%arg0: i32) -> (i32, i32) {
    %c0_i32 = arith.constant 0 : i32
    %c0_i32_0 = arith.constant 0 : i32
    %c0_i32_1 = arith.constant 0 : i32
    return %c0_i32, %c0_i32_0 : i32, i32
  }
  func.func @transform_5(%arg0: i32) -> (i32, i32) {
    %c0_i32 = arith.constant 0 : i32
    %c0_i32_0 = arith.constant 0 : i32
    return %arg0, %c0_i32 : i32, i32
  }
}

</mosaic_0001>

<bundles_post_ra>
// kernel: tpu_custom_call.1
= control target key start
LH: loop header
LB: loop body
LE: loop exit
PB: predicated region body
PF: predicated region fallthrough
CT: control target
= control target key end

     0   :  { %10 = vsyncpa [#allocation3], 0  ;;  %s976_s0 = inlined_call_operand.hbm [shape: bf16[32,48], index: 0, kind: input, shape index: {}]   ;;  %s977_s1 = inlined_call_operand.hbm [shape: bf16[48,96], index: 1, kind: input, shape index: {}]   ;;  %s978_s2 = inlined_call_operand.vmem [shape: f32[1,96], index: 2, kind: input, shape index: {}]   ;;  %s979_s3 = inlined_call_operand.vmem [shape: f32[1,96], index: 3, kind: input, shape index: {}]   ;;  %s980_s4 = inlined_call_operand.vmem [shape: f32[1,96], index: 4, kind: input, shape index: {}]   ;;  %s981_s5 = inlined_call_operand.hbm [shape: bf16[32,96], index: 5, kind: output, shape index: {}]  }
   0x1   :  { %12 = vsyncpa [#allocation3 + $0x1], 0 }
   0x2   :  { %13 = vsyncpa [#allocation6], 0 }
   0x3   :  { %14 = vsyncpa [#allocation4], 0 }
   0x4   :  { %16 = vsyncpa [#allocation4 + $0x1], 0  ;;  %s776_s18 = smov 0   ;;  %s778_s19 = smov 0  }
   0x5   :  { %s780_s20 = smov 0   ;;  %s782_s21 = smov 0  }
   0x6 LB: > { %s797_s22 = sadd.s32 4294967295, %s735_s21   ;;  %s498_s23 = sadd.s32 4294967294, %s735_s21   ;;  %s735_s21 = sphi %s782_s21, %s1005_s21   ;;  %s731_s20 = sphi %s780_s20, %s1004_s20   ;;  %s727_s19 = sphi %s778_s19, %s1003_s19   ;;  %s723_s18 = sphi %s776_s18, %s1002_s18  }
   0x7   : > { %p42_p0 = scmp.ne.s32.totalorder %s727_s19, %s723_s18  ;;  %p982_p1 = scmp.eq.s32.totalorder %s797_s22, 0 }
   0x8   : > { %p156_p3 = scmp.eq.s32.totalorder %s498_s23, 1  ;;  %p499_p5 = scmp.ge.s32.totalorder %s735_s21, 1 }
   0x9   : > { %p806_p4 = por %p982_p1, %p42_p0  ;;  %p163_p7 = scmp.lt.s32.totalorder %s735_s21, 3 }
   0xa   : > { %p811_p6 = por %p156_p3, %p42_p0  ;;  %s737_s27 = smov [#allocation5]  }
   0xb   : > { %s987_s24 = scalar_select %p806_p4, 1, 0 }
   0xc   : > { %s988_s25 = scalar_select %p811_p6, 1, 0 }
   0xd   : > { %p816_p8 = pnand %p499_p5, %p163_p7  ;;  %s175_s28 = sshll.u32 %s737_s27, 4  ;;  %s176_s28 = int_to_ptr.vmem [resolvable:$true] %s175_s28 }
   0xe   : > { %s830_s30 = sadd.s32 1, %s735_s21   ;;  %s29_s6 = sadd.s32 1, %s731_s20 }
   0xf   : > { %s989_s26 = scalar_select %p816_p8, 1, 0 }
  0x10   : > { %p550_p9 = pneg %p816_p8  ;;  %s26_s7 = ssub.s32 %s735_s21, %s830_s30 }
  0x11   : > { %s624_s8 = scalar_lea.vmem %s176_s28, 384  ;;  %p632_p5 = scmp.lt.s32.totalorder %s176_s28, %s176_s28 }
  0x12   : > { %p825_p11 = pnand %p550_p9, %p982_p1  ;;  %p625_p13 = scmp.ne.s32.totalorder %s176_s28, %s624_s8 }
  0x13   : > { %p633_p7 = scmp.lt.s32.totalorder %s624_s8, %s624_s8 }
  0x14   : > { %p615_p12 = pneg %p825_p11 }
  0x15   : > { %p634_p10 = por %p633_p7, %p632_p5 }
  0x16   : > { %p627_p0 = pnand %p625_p13, %p615_p12 }
  0x18   : > { %p628_p3 = pneg %p627_p0 }
  0x1a   : > { %p635_p2 = pnand %p634_p10, %p628_p3 }
  0x1c   : > { %638 = shalt.err (!%p635_p2)
}
  0x1d   : > { %s983_s9 = smov 64   ;;  %s739_s10 = smov 4  }
  0x1e   : > { %553 = dma.hbm_to_vmem [thread:$0]  (!%p825_p11), %s977_s1, 384, %s176_s28, [#allocation6], %s983_s9, %s983_s9, %s739_s10  }
  0x1f   : > { %p27_p2 = scmp.eq.s32.totalorder %s26_s7, 0  ;;  %p36_p9 = scmp.ne.s32.totalorder %s731_s20, %s727_s19 }
  0x20   : > { %p37_p10 = scmp.eq.s32.totalorder %s735_s21, 0  ;;  %p563_p12 = scmp.lt.s32.totalorder %s735_s21, 2 }
  0x21   : > { %s850_s13 = scalar_select %p27_p2, %s731_s20, %s29_s6  }
  0x22   : > { %p38_p13 = por %p37_p10, %p36_p9  ;;  %p991_p0 = scmp.eq.s32.totalorder %s797_s22, 1 }
  0x23   : > { %s198_s15 = sand.u32 1, %s731_s20   ;;  %s524_s16 = sshll.u32 %s735_s21, 7 }
  0x24   : > { %p854_p3 = por %p991_p0, %p36_p9  ;;  %s502_s17 = sshll.u32 %s198_s15, 3 }
  0x25   : > { %s863_s29 = scalar_lea.hbm %s976_s0, %s524_s16  ;;  %s202_s28 = scalar_lea.vmem [#allocation2], %s502_s17 }
  0x26   : > { %s992_s14 = scalar_select %p854_p3, 1, 0 }
  0x27   : > { %s209_s6 = sshll.u32 %s202_s28, 4  ;;  %p865_p11 = pnand %p563_p12, %p38_p13  ;;  %s869_s6 = int_to_ptr.vmem [resolvable:$true] %s209_s6 }
  0x28   : > { %s871_s8 = scalar_lea.sflag [#allocation3], %s198_s15  ;;  %s639_s11 = scalar_lea.hbm %s863_s29, 128 }
  0x29   : > { %p640_p5 = scmp.ne.s32.totalorder %s863_s29, %s639_s11  ;;  %p641_p7 = pneg %p865_p11 }
  0x2a   : > { %s644_s17 = scalar_lea.hbm %s976_s0, 256  ;;  %p645_p10 = scmp.lt.s32.totalorder %s863_s29, %s976_s0 }
  0x2b   : > { %p642_p2 = pnand %p641_p7, %p640_p5  ;;  %p646_p12 = scmp.lt.s32.totalorder %s644_s17, %s639_s11 }
  0x2d   : > { %p643_p9 = pneg %p642_p2  ;;  %p647_p13 = por %p646_p12, %p645_p10 }
  0x2f   : > { %p648_p0 = pnand %p647_p13, %p643_p9 }
  0x31   : > { %651 = shalt.err (!%p648_p0)
}
  0x32   : > { %s652_s15 = scalar_lea.vmem %s869_s6, 128  ;;  %s740_s28 = smov [#allocation2]  }
  0x33   : > { %p653_p1 = scmp.ne.s32.totalorder %s869_s6, %s652_s15  ;;  %s657_s9 = sshll.u32 %s740_s28, 4  ;;  %s658_s9 = int_to_ptr.vmem [resolvable:$false] %s657_s9 }
  0x34   : > { %s659_s12 = scalar_lea.vmem %s658_s9, 256  ;;  %p660_p2 = scmp.lt.s32.totalorder %s869_s6, %s658_s9 }
  0x35   : > { %p655_p6 = pnand %p653_p1, %p641_p7  ;;  %p661_p3 = scmp.lt.s32.totalorder %s659_s12, %s652_s15 }
  0x37   : > { %p656_p5 = pneg %p655_p6  ;;  %p662_p4 = por %p661_p3, %p660_p2 }
  0x39   : > { %p663_p8 = pnand %p662_p4, %p656_p5 }
  0x3b   : > { %666 = shalt.err (!%p663_p8)
}
  0x3c   : > { %s994_s11 = smov 64   ;;  %p995_p1 = scmp.ne.s32.totalorder %s989_s26, 0 }
  0x3d   : > { %557 = dma.hbm_to_vmem [thread:$0]  (!%p865_p11), %s863_s29, 128, %s869_s6, %s871_s8, %s994_s11, %s994_s11, %s739_s10  }
  0x3e   : > { %221 = sbr.rel (%p995_p1) target bundleno = 607 (0x25f), region = 40  ;;  %s898_s16 = sand.u32 (!%p995_p1), 1, %s727_s19  }
  0x3f   : > { %s506_s9 = sshll.u32 (!%p995_p1), %s898_s16, 3  ;;  %s224_s17 = scalar_lea.sflag (!%p995_p1), [#allocation3], %s898_s16 }
  0x40   : > { %s227_s7 = scalar_lea.vmem (!%p995_p1), [#allocation2], %s506_s9  ;;  %p996_p4 = scmp.ne.s32.totalorder (!%p995_p1), %s987_s24, 0 }
  0x43   : > { %710 = dma.done.wait (%p996_p4), %s224_s17, 128  }
  0x44   : > { %712 = vsyncadd (%p996_p4), %s224_s17, 4294967168  ;;  %p997_p6 = scmp.eq.s32.totalorder %s797_s22, 0 }
  0x46   : > { %714 = dma.done.wait (%p997_p6), [#allocation6], 384   ;;  %p998_p8 = pmov %p997_p6 }
  0x47   : > { %v741_v0 = vmov 0.0   ;;  %vm742_vm0 = vmmov 0   ;;  %v605_v1 = vld [vmem:[#allocation5 + $0x10] sm:$0xff]   ;;  %v606_v2 = vld [vmem:[#allocation5 + $0x8] sm:$0xff]   ;;  %v607_v3 = vld [vmem:[#allocation5] sm:$0xff]   ;;  %vm299_vm1 = vcmask 392192  }
  0x48   : > { %716 = vsyncadd (%p998_p8), [#allocation6], 4294966912  ;;  %532 = vmatprep.subr.bf16.mxu0 %v741_v0  ;;  %538 = vmatprep.mubr.msk.bf16.mxu0 %vm742_vm0, %v741_v0  ;;  %v608_v4 = vld [vmem:[%s227_s7] sm:$0xff]   ;;  %vm344_vm2 = vcmask 785408   ;;  %vm398_vm3 = vcmask 781312   ;;  %s527_s23 = sshll.u32 %s797_s22, 7 }
  0x49   : > { %533 = vmatpush3.bf16.msra.mxu0 %v605_v1  ;;  %v509_v5 = vld [vmem:[%s978_s2] ss:$0 sm:$0xff]  ;;  %s257_s27 = scalar_lea.vmem [#allocation7], %s506_s9  ;;  %s931_s11 = scalar_lea.hbm %s981_s5, %s527_s23 }
  0x4a   : > { %534 = vmatprep.subr.bf16.mxu0 %v741_v0  ;;  %v515_v31 = vld [vmem:[%s979_s3] ss:$0 sm:$0xff]  ;;  %s415_s15 = sshll.u32 %s257_s27, 4  ;;  %s402_s17 = scalar_lea.sflag [#allocation4], %s898_s16  ;;  %s933_s15 = int_to_ptr.vmem [resolvable:$true] %s415_s15 }
  0x4b   : > { %v516_v33 = vld [vmem:[%s980_s4] ss:$0 sm:$0xff]  ;;  %s667_s7 = scalar_lea.vmem %s933_s15, 128  ;;  %p999_p11 = scmp.ne.s32.totalorder %s992_s14, 0 }
  0x4c   : > { %p668_p3 = scmp.ne.s32.totalorder %s933_s15, %s667_s7  ;;  %s743_s22 = smov [#allocation7]  }
  0x4d   : > { %535 = vmatpush3.bf16.msra.mxu0 %v606_v2  ;;  %s671_s9 = sshll.u32 %s743_s22, 4  ;;  %s672_s9 = int_to_ptr.vmem [resolvable:$false] %s671_s9 }
  0x4e   : > { %536 = vmatprep.subr.bf16.mxu0 %v741_v0  ;;  %p669_p7 = pnand %p668_p3, %p999_p11  ;;  %s673_s24 = scalar_lea.vmem %s672_s9, 256 }
  0x4f   : > { %p674_p10 = scmp.lt.s32.totalorder %s933_s15, %s672_s9  ;;  %p675_p12 = scmp.lt.s32.totalorder %s673_s24, %s667_s7 }
  0x50   : > { %p670_p9 = pneg %p669_p7 }
  0x51   : > { %537 = vmatpush3.bf16.msra.mxu0 %v607_v3  ;;  %p676_p13 = por %p675_p12, %p674_p10 }
  0x53   : > { %p677_p0 = pnand %p676_p13, %p670_p9 }
  0x54   : > { %539 = vmatmul.mubr.msk.bf16.vlgmr.msra.gmra.mxu0 %vm299_vm1, %v608_v4 }
 0x114   : > { %v337_v6 = vpop.f32.mrf.mxu0 }
 0x115   : > { %v338_v7 = vadd.f32 %v509_v5, %v337_v6 }
 0x116   : > { %v540_v8 = vpop.f32.mrf.mxu0 }
 0x117   : > { %v345_v9 = vsel %vm344_vm2, %v338_v7, 0.0 }
 0x118   : > { %346 = vadd.xlane.f32.xlu0 %v345_v9  ;;  %v340_v10 = vpop.f32.mrf.mxu0 }
 0x119   : > { %v341_v11 = vadd.f32 %v509_v5, %v340_v10 }
 0x11a   : > { %v541_v12 = vpop.f32.mrf.mxu0 }
 0x11b   : > { %v348_v13 = vsel %vm344_vm2, %v341_v11, 0.0 }
 0x11c   : > { %349 = vadd.xlane.f32.xlu0 %v348_v13 }
 0x1a1   : > { %v347_v14 = vpop.xlane.xlu0 %346 }
 0x1a2   : > { %v352_v15 = vmul.f32 0.010416667, %v347_v14 }
 0x1a4   : > { %v354_v16 = vsub.f32 %v338_v7, %v352_v15 }
 0x1a5   : > { %v350_v17 = vpop.xlane.xlu0 %349 }
 0x1a6   : > { %v353_v18 = vmul.f32 0.010416667, %v350_v17  ;;  %v356_v19 = vmul.f32 %v354_v16, %v354_v16 }
 0x1a8   : > { %v355_v20 = vsub.f32 %v341_v11, %v353_v18  ;;  %v358_v21 = vsel %vm344_vm2, %v356_v19, 0.0 }
 0x1a9   : > { %359 = vadd.xlane.f32.xlu1 %v358_v21 }
 0x1aa   : > { %v357_v22 = vmul.f32 %v355_v20, %v355_v20 }
 0x1ac   : > { %v361_v23 = vsel %vm344_vm2, %v357_v22, 0.0 }
 0x1ad   : > { %362 = vadd.xlane.f32.xlu1 %v361_v23 }
 0x232   : > { %v360_v24 = vpop.xlane.xlu1 %359 }
 0x233   : > { %v364_v25 = vmul.f32 0.010416667, %v360_v24 }
 0x235   : > { %v366_v26 = vadd.f32 1e-05, %v364_v25 }
 0x236   : > { %v363_v27 = vpop.xlane.xlu1 %362 }
 0x237   : > { %609 = vrsqrt.f32 %v366_v26  ;;  %v365_v28 = vmul.f32 0.010416667, %v363_v27 }
 0x239   : > { %v367_v29 = vadd.f32 1e-05, %v365_v28 }
 0x23b   : > { %611 = vrsqrt.f32 %v367_v29 }
 0x244   : > { %v610_v30 = vpop.eup %609 }
 0x245   : > { %v370_v32 = vmul.f32 %v610_v30, %v354_v16 }
 0x247   : > { %v379_v34 = vmul.f32 %v515_v31, %v370_v32 }
 0x248   : > { %v612_v35 = vpop.eup %611 }
 0x249   : > { %v388_v36 = vadd.f32 %v516_v33, %v379_v34  ;;  %v371_v37 = vmul.f32 %v612_v35, %v355_v20 }
 0x24b   : > { %v525_v38 = vpack.c.bf16 %v388_v36, %v388_v36  ;;  %v380_v39 = vmul.f32 %v515_v31, %v371_v37 }
 0x24d   : > { %v389_v40 = vadd.f32 %v516_v33, %v380_v39  ;;  %399 = vst.msk [vmem:[%s257_s27] sm:$0xf] %vm398_vm3, %v525_v38 }
 0x24f   : > { %v526_v41 = vpack.c.bf16 %v389_v40, %v389_v40 }
 0x251   : > { %400 = vst.msk [vmem:[%s257_s27 + $0x4] sm:$0xf] %vm398_vm3, %v526_v41 }
 0x252   : > { %680 = shalt.err (!%p677_p0)
}
 0x253   : > { %s681_s26 = scalar_lea.hbm %s931_s11, 128  ;;  %s685_s6 = scalar_lea.hbm %s981_s5, 256 }
 0x254   : > { %p682_p5 = scmp.ne.s32.totalorder %s931_s11, %s681_s26  ;;  %p686_p4 = scmp.lt.s32.totalorder %s931_s11, %s981_s5 }
 0x255   : > { %p687_p6 = scmp.lt.s32.totalorder %s685_s6, %s681_s26 }
 0x256   : > { %p683_p2 = pnand %p682_p5, %p999_p11 }
 0x257   : > { %p688_p8 = por %p687_p6, %p686_p4 }
 0x258   : > { %p684_p1 = pneg %p683_p2 }
 0x25a   : > { %p689_p3 = pnand %p688_p8, %p684_p1 }
 0x25c   : > { %692 = shalt.err (!%p689_p3)
}
 0x25d   : > { %s744_s27 = smov 64   ;;  %s745_s28 = smov 4  }
 0x25e   : > { %548 = dma.vmem_to_hbm [thread:$0]  (%p999_p11), %s933_s15, 128, %s931_s11, %s402_s17, %s744_s27, %s744_s27, %s745_s28  }
 0x25f PF: > { %s430_s12 = sand.u32 1, %s723_s18   ;;  %p1000_p7 = scmp.ne.s32.totalorder %s988_s25, 0 }
 0x260   : > { %p1001_p9 = scmp.ge.s32.totalorder %s735_s21, 2  ;;  %s431_s7 = scalar_lea.sflag [#allocation4], %s430_s12 }
 0x262   : > { %p559_p10 = pnand %p1001_p9, %p1000_p7 }
 0x264   : > { %p560_p12 = pneg %p559_p10 }
 0x266   : > { %718 = dma.done.wait (%p560_p12), %s431_s7, 128  }
 0x267   : > { %720 = vsyncadd (%p560_p12), %s431_s7, 4294967168  ;;  %p19_p13 = scmp.ge.s32.totalorder %s830_s30, 4   ;;  %s1002_s18 = smov %s727_s19 }
 0x268   : > { %s1003_s19 = smov %s731_s20  ;;  %s1004_s20 = smov %s850_s13 }
 0x269   : > { %s1005_s21 = smov %s830_s30  ;;  %21 = sbr.rel (!%p19_p13) target bundleno = 6 (0x6), region = 89 }
 0x26e   :  { %436 = vsyncpa [#allocation3], 1 }
 0x26f   :  { %438 = vsyncpa [#allocation3 + $0x1], 1 }
 0x270   :  { %439 = vsyncpa [#allocation6], 1 }
 0x271   :  { %440 = vsyncpa [#allocation4], 1 }
 0x272   :  { %442 = vsyncpa [#allocation4 + $0x1], 1 }

</bundles_post_ra>
